<compile_context>
chip_gen: v7x
topology: tpu7x:2x2x1
jax: 0.10.0
libtpu: 0.0.40
codegen_flags: <defaults>
</compile_context>

<pallas_src>
import functools

import jax
import jax.numpy as jnp
from jax.experimental import pallas as pl
from jax.experimental.pallas import tpu as pltpu

HIDDEN = 128        # hidden width of fc1/fc2 (matches nn.Linear(_, 128))
HEAD_WIDTH = 128    # lane-dense padded width of the fused value+advantage head
LN_EPS = 1e-5


def _round_up(x, m):
    return ((x + m - 1) // m) * m


def _layer_norm(x, gamma, beta):
    # Normalize over the last dim (== nn.LayerNorm(128)); all math in f32.
    mean = jnp.mean(x, axis=-1, keepdims=True)
    centered = x - mean
    var = jnp.mean(centered * centered, axis=-1, keepdims=True)
    return centered * jax.lax.rsqrt(var + LN_EPS) * gamma + beta


def dqn_kernel(x_ref, w1_ref, w2_ref, wh_ref, vec_ref, q_ref, *, action_size):
    # Packed per-feature vectors: one f32 (8, 128) slab.
    #   rows: 0=b1, 1=g1, 2=be1, 3=b2, 4=g2, 5=be2, 6=fused head bias, 7=pad
    b1, g1, be1 = vec_ref[0:1, :], vec_ref[1:2, :], vec_ref[2:3, :]
    b2, g2, be2 = vec_ref[3:4, :], vec_ref[4:5, :], vec_ref[5:6, :]
    bh = vec_ref[6:7, :]

    # fc1 -> ln1 -> relu   (bf16 matmul operands, f32 accumulation + LN)
    x = x_ref[...].astype(jnp.bfloat16)
    h1 = jnp.dot(x, w1_ref[...], preferred_element_type=jnp.float32) + b1
    h1 = jnp.maximum(_layer_norm(h1, g1, be1), 0.0)

    # fc2 -> ln2 -> relu
    h2 = jnp.dot(h1.astype(jnp.bfloat16), w2_ref[...],
                 preferred_element_type=jnp.float32) + b2
    h2 = jnp.maximum(_layer_norm(h2, g2, be2), 0.0)

    # Fused head: cols [0, A) = advantage, col A = value, cols (A, 128) = 0.
    head = jnp.dot(h2.astype(jnp.bfloat16), wh_ref[...],
                   preferred_element_type=jnp.float32) + bh

    # Value from a single masked cross-lane reduce; advantage sum from the
    # full-row sum minus the value lane (lanes (A, 128) are exactly zero).
    lane = jax.lax.broadcasted_iota(jnp.int32, head.shape, dimension=1)
    value = jnp.sum(jnp.where(lane == action_size, head, 0.0),
                    axis=-1, keepdims=True)
    adv_mean = (jnp.sum(head, axis=-1, keepdims=True) - value) \
        * (1.0 / action_size)

    # q = value + (adv - mean(adv)) in lanes [0, A); padded lanes hold garbage
    # and are sliced off in the wrapper.  Lane-dense (TB, 128) bf16 store.
    q_ref[...] = (head + (value - adv_mean)).astype(q_ref.dtype)


def pack_params(p, action_size):
    """Pack nn.Linear / LayerNorm params into 4 (8,128)-friendly slabs.

    Matmul weights are stored in bf16 (f32 accumulation in-kernel); biases and
    LayerNorm gamma/beta stay f32 for LN precision.
    """
    assert action_size + 1 <= HEAD_WIDTH, "action_size must fit in 127 lanes"

    wh = jnp.zeros((HIDDEN, HEAD_WIDTH), jnp.float32)
    wh = wh.at[:, :action_size].set(p["wa"])          # advantage weights
    wh = wh.at[:, action_size].set(p["wv"][:, 0])     # value weights

    bh = jnp.zeros((HEAD_WIDTH,), jnp.float32)
    bh = bh.at[:action_size].set(p["ba"])
    bh = bh.at[action_size].set(p["bv"][0])

    vecs = jnp.stack(
        [p["b1"], p["g1"], p["be1"],
         p["b2"], p["g2"], p["be2"],
         bh, jnp.zeros((HEAD_WIDTH,), jnp.float32)], axis=0)   # (8, 128) f32

    return {"w1": p["w1"].astype(jnp.bfloat16),
            "w2": p["w2"].astype(jnp.bfloat16),
            "wh": wh.astype(jnp.bfloat16),
            "vecs": vecs}


@functools.partial(jax.jit, static_argnames=("action_size", "block_batch"))
def dqn_forward(x, packed, *, action_size, block_batch=1024):
    batch, state_size = x.shape

    # Pad the batch only to a multiple of 8 sublanes.
    padded_batch = _round_up(batch, 8)
    if padded_batch != batch:
        x = jnp.pad(x, ((0, padded_batch - batch), (0, 0)))

    # Batch tile: multiple of 8, capped at block_batch, and chosen so the grid
    # has >= 2 steps whenever the batch allows it (v7x: lets the "parallel"
    # axis shard across both TensorCores; harmless on v5e/v6e).
    tb = max(8, min(block_batch, _round_up(pl.cdiv(padded_batch, 2), 8)))
    grid = (pl.cdiv(padded_batch, tb),)   # partial final block is fine

    kernel = functools.partial(dqn_kernel, action_size=action_size)

    q_pad = pl.pallas_call(
        kernel,
        out_shape=jax.ShapeDtypeStruct((padded_batch, HEAD_WIDTH),
                                       jnp.bfloat16),
        grid=grid,
        in_specs=[
            pl.BlockSpec((tb, state_size), lambda i: (i, 0)),        # x: batch-tiled
            pl.BlockSpec((state_size, HIDDEN), lambda i: (0, 0)),    # W1 (bf16), resident
            pl.BlockSpec((HIDDEN, HIDDEN), lambda i: (0, 0)),        # W2 (bf16), resident
            pl.BlockSpec((HIDDEN, HEAD_WIDTH), lambda i: (0, 0)),    # fused head W (bf16)
            pl.BlockSpec((8, HEAD_WIDTH), lambda i: (0, 0)),         # packed f32 vectors
        ],
        out_specs=pl.BlockSpec((tb, HEAD_WIDTH), lambda i: (i, 0)),
        compiler_params=pltpu.CompilerParams(
            dimension_semantics=("parallel",)),
    )(x, packed["w1"], packed["w2"], packed["wh"], packed["vecs"])

    # Slice back to the true batch / action count (bf16 q-values).
    return q_pad[:batch, :action_size]


def init_params(key, state_size, action_size):
    """Deterministic synthetic parameters (shapes match the PyTorch module,
    with weights stored as (in_features, out_features))."""
    ks = jax.random.split(key, 8)

    def lin(kw, kb, fan_in, fan_out):
        bound = 1.0 / (fan_in ** 0.5)
        w = jax.random.uniform(kw, (fan_in, fan_out), jnp.float32, -bound, bound)
        b = jax.random.uniform(kb, (fan_out,), jnp.float32, -bound, bound)
        return w, b

    w1, b1 = lin(ks[0], ks[1], state_size, HIDDEN)
    w2, b2 = lin(ks[2], ks[3], HIDDEN, HIDDEN)
    wv, bv = lin(ks[4], ks[5], HIDDEN, 1)
    wa, ba = lin(ks[6], ks[7], HIDDEN, action_size)

    return {
        "w1": w1, "b1": b1,
        "g1": jnp.ones((HIDDEN,), jnp.float32),
        "be1": jnp.zeros((HIDDEN,), jnp.float32),
        "w2": w2, "b2": b2,
        "g2": jnp.ones((HIDDEN,), jnp.float32),
        "be2": jnp.zeros((HIDDEN,), jnp.float32),
        "wv": wv, "bv": bv,
        "wa": wa, "ba": ba,
    }


def dqn_forward_ref(x, p):
    """Pure-JAX f32 reference (mirrors the PyTorch forward)."""
    def ln(h, g, b):
        m = jnp.mean(h, -1, keepdims=True)
        v = jnp.mean((h - m) ** 2, -1, keepdims=True)
        return (h - m) * jax.lax.rsqrt(v + LN_EPS) * g + b

    h1 = jnp.maximum(ln(x @ p["w1"] + p["b1"], p["g1"], p["be1"]), 0.0)
    h2 = jnp.maximum(ln(h1 @ p["w2"] + p["b2"], p["g2"], p["be2"]), 0.0)
    value = h2 @ p["wv"] + p["bv"]
    adv = h2 @ p["wa"] + p["ba"]
    return value + (adv - jnp.mean(adv, axis=1, keepdims=True))


def _check(q, q_ref, shape, name):
    assert q.shape == shape, f"{name}: wrong shape {q.shape}"
    # bf16 matmul operands + bf16 output -> loosened tolerance vs f32 ref.
    ok = jnp.allclose(q.astype(jnp.float32), q_ref, atol=5e-2, rtol=5e-2)
    assert ok, f"mismatch vs reference ({name})"


if __name__ == "__main__":
    STATE_SIZE = 16
    ACTION_SIZE = 8

    key = jax.random.PRNGKey(0)
    k_x, k_x2, k_x3, k_p = jax.random.split(key, 4)

    params = init_params(k_p, STATE_SIZE, ACTION_SIZE)
    packed = pack_params(params, ACTION_SIZE)

    # Case 1: small batch, single grid step.
    x = jax.random.normal(k_x, (8, STATE_SIZE), dtype=jnp.float32)
    q = dqn_forward(x, packed, action_size=ACTION_SIZE)
    jax.block_until_ready(q)
    _check(q, dqn_forward_ref(x, params), (8, ACTION_SIZE), "case 1")

    # Case 2: exercises the batch grid (3 tiles of 8 rows) + parallel axis.
    x2 = jax.random.normal(k_x2, (24, STATE_SIZE), dtype=jnp.float32)
    q2 = dqn_forward(x2, packed, action_size=ACTION_SIZE, block_batch=8)
    jax.block_until_ready(q2)
    _check(q2, dqn_forward_ref(x2, params), (24, ACTION_SIZE), "case 2")

    # Case 3: non-divisible batch -> zero-padded rows + partial final block
    # (grid = cdiv(24, 16) = 2, second block overhangs).
    x3 = jax.random.normal(k_x3, (20, STATE_SIZE), dtype=jnp.float32)
    q3 = dqn_forward(x3, packed, action_size=ACTION_SIZE, block_batch=16)
    jax.block_until_ready(q3)
    _check(q3, dqn_forward_ref(x3, params), (20, ACTION_SIZE), "case 3")

    print("KERNEL_OK")
</pallas_src>

<mosaic_0001>
module attributes {stable_mosaic.version = 11 : i64} {
  func.func @dqn_kernel(%arg0: i32, %arg1: memref<8x16xf32, #tpu.memory_space<vmem>>, %arg2: memref<16x128xbf16, #tpu.memory_space<vmem>>, %arg3: memref<128x128xbf16, #tpu.memory_space<vmem>>, %arg4: memref<128x128xbf16, #tpu.memory_space<vmem>>, %arg5: memref<8x128xf32, #tpu.memory_space<vmem>>, %arg6: memref<8x128xbf16, #tpu.memory_space<vmem>>) attributes {dimension_semantics = [#tpu.dimension_semantics<parallel>], iteration_bounds = array<i64: 1>, scalar_prefetch = 0 : i64, scratch_operands = 0 : i64, tpu.core_type = #tpu.core_type<tc>, window_params = [{transform_indices = @transform_0, window_bounds = array<i64: 8, 16>}, {pipeline_mode = #tpu.pipeline_mode<synchronous>, transform_indices = @transform_1, window_bounds = array<i64: 16, 128>}, {pipeline_mode = #tpu.pipeline_mode<synchronous>, transform_indices = @transform_2, window_bounds = array<i64: 128, 128>}, {pipeline_mode = #tpu.pipeline_mode<synchronous>, transform_indices = @transform_3, window_bounds = array<i64: 128, 128>}, {pipeline_mode = #tpu.pipeline_mode<synchronous>, transform_indices = @transform_4, window_bounds = array<i64: 8, 128>}, {transform_indices = @transform_5, window_bounds = array<i64: 8, 128>}]} {
    %c0 = arith.constant 0 : index
    %c0_0 = arith.constant 0 : index
    %0 = vector.load %arg5[%c0, %c0_0] : memref<8x128xf32, #tpu.memory_space<vmem>>, vector<1x128xf32>
    %c1 = arith.constant 1 : index
    %c0_1 = arith.constant 0 : index
    %1 = vector.load %arg5[%c1, %c0_1] : memref<8x128xf32, #tpu.memory_space<vmem>>, vector<1x128xf32>
    %c2 = arith.constant 2 : index
    %c0_2 = arith.constant 0 : index
    %2 = vector.load %arg5[%c2, %c0_2] : memref<8x128xf32, #tpu.memory_space<vmem>>, vector<1x128xf32>
    %c3 = arith.constant 3 : index
    %c0_3 = arith.constant 0 : index
    %3 = vector.load %arg5[%c3, %c0_3] : memref<8x128xf32, #tpu.memory_space<vmem>>, vector<1x128xf32>
    %c4 = arith.constant 4 : index
    %c0_4 = arith.constant 0 : index
    %4 = vector.load %arg5[%c4, %c0_4] : memref<8x128xf32, #tpu.memory_space<vmem>>, vector<1x128xf32>
    %c5 = arith.constant 5 : index
    %c0_5 = arith.constant 0 : index
    %5 = vector.load %arg5[%c5, %c0_5] : memref<8x128xf32, #tpu.memory_space<vmem>>, vector<1x128xf32>
    %c6 = arith.constant 6 : index
    %c0_6 = arith.constant 0 : index
    %6 = vector.load %arg5[%c6, %c0_6] : memref<8x128xf32, #tpu.memory_space<vmem>>, vector<1x128xf32>
    %c0_7 = arith.constant 0 : index
    %c0_8 = arith.constant 0 : index
    %7 = vector.load %arg1[%c0_7, %c0_8] : memref<8x16xf32, #tpu.memory_space<vmem>>, vector<8x16xf32>
    %8 = arith.truncf %7 : vector<8x16xf32> to vector<8x16xbf16>
    %c0_9 = arith.constant 0 : index
    %c0_10 = arith.constant 0 : index
    %9 = vector.load %arg2[%c0_9, %c0_10] : memref<16x128xbf16, #tpu.memory_space<vmem>>, vector<16x128xbf16>
    %cst = arith.constant dense<0.000000e+00> : vector<8x128xf32>
    %10 = tpu.matmul %8, %9, %cst {dimension_numbers = #tpu.dot_dimension_numbers<[1], [0], [0], [1], [0, 0, 1, 1], [], []>} : vector<8x16xbf16>, vector<16x128xbf16>, vector<8x128xf32> -> vector<8x128xf32>
    %11 = vector.broadcast %0 : vector<1x128xf32> to vector<8x128xf32>
    %12 = arith.addf %10, %11 : vector<8x128xf32>
    %cst_11 = arith.constant dense<0.000000e+00> : vector<8xf32>
    %13 = vector.multi_reduction <add>, %12, %cst_11 [1] : vector<8x128xf32> to vector<8xf32>
    %14 = vector.shape_cast %13 : vector<8xf32> to vector<8x1xf32>
    %cst_12 = arith.constant 1.280000e+02 : f32
    %15 = vector.broadcast %cst_12 : f32 to vector<8x1xf32>
    %16 = arith.divf %14, %15 : vector<8x1xf32>
    %17 = vector.broadcast %16 : vector<8x1xf32> to vector<8x128xf32>
    %18 = arith.subf %12, %17 : vector<8x128xf32>
    %19 = arith.mulf %18, %18 : vector<8x128xf32>
    %cst_13 = arith.constant dense<0.000000e+00> : vector<8xf32>
    %20 = vector.multi_reduction <add>, %19, %cst_13 [1] : vector<8x128xf32> to vector<8xf32>
    %21 = vector.shape_cast %20 : vector<8xf32> to vector<8x1xf32>
    %cst_14 = arith.constant 1.280000e+02 : f32
    %22 = vector.broadcast %cst_14 : f32 to vector<8x1xf32>
    %23 = arith.divf %21, %22 : vector<8x1xf32>
    %cst_15 = arith.constant 9.99999974E-6 : f32
    %24 = vector.broadcast %cst_15 : f32 to vector<8x1xf32>
    %25 = arith.addf %23, %24 : vector<8x1xf32>
    %26 = math.rsqrt %25 : vector<8x1xf32>
    %27 = vector.broadcast %26 : vector<8x1xf32> to vector<8x128xf32>
    %28 = arith.mulf %18, %27 : vector<8x128xf32>
    %29 = vector.broadcast %1 : vector<1x128xf32> to vector<8x128xf32>
    %30 = arith.mulf %28, %29 : vector<8x128xf32>
    %31 = vector.broadcast %2 : vector<1x128xf32> to vector<8x128xf32>
    %32 = arith.addf %30, %31 : vector<8x128xf32>
    %cst_16 = arith.constant 0.000000e+00 : f32
    %33 = vector.broadcast %cst_16 : f32 to vector<8x128xf32>
    %34 = arith.maximumf %32, %33 : vector<8x128xf32>
    %35 = arith.truncf %34 : vector<8x128xf32> to vector<8x128xbf16>
    %c0_17 = arith.constant 0 : index
    %c0_18 = arith.constant 0 : index
    %36 = vector.load %arg3[%c0_17, %c0_18] : memref<128x128xbf16, #tpu.memory_space<vmem>>, vector<128x128xbf16>
    %cst_19 = arith.constant dense<0.000000e+00> : vector<8x128xf32>
    %37 = tpu.matmul %35, %36, %cst_19 {dimension_numbers = #tpu.dot_dimension_numbers<[1], [0], [0], [1], [0, 0, 1, 1], [], []>} : vector<8x128xbf16>, vector<128x128xbf16>, vector<8x128xf32> -> vector<8x128xf32>
    %38 = vector.broadcast %3 : vector<1x128xf32> to vector<8x128xf32>
    %39 = arith.addf %37, %38 : vector<8x128xf32>
    %cst_20 = arith.constant dense<0.000000e+00> : vector<8xf32>
    %40 = vector.multi_reduction <add>, %39, %cst_20 [1] : vector<8x128xf32> to vector<8xf32>
    %41 = vector.shape_cast %40 : vector<8xf32> to vector<8x1xf32>
    %cst_21 = arith.constant 1.280000e+02 : f32
    %42 = vector.broadcast %cst_21 : f32 to vector<8x1xf32>
    %43 = arith.divf %41, %42 : vector<8x1xf32>
    %44 = vector.broadcast %43 : vector<8x1xf32> to vector<8x128xf32>
    %45 = arith.subf %39, %44 : vector<8x128xf32>
    %46 = arith.mulf %45, %45 : vector<8x128xf32>
    %cst_22 = arith.constant dense<0.000000e+00> : vector<8xf32>
    %47 = vector.multi_reduction <add>, %46, %cst_22 [1] : vector<8x128xf32> to vector<8xf32>
    %48 = vector.shape_cast %47 : vector<8xf32> to vector<8x1xf32>
    %cst_23 = arith.constant 1.280000e+02 : f32
    %49 = vector.broadcast %cst_23 : f32 to vector<8x1xf32>
    %50 = arith.divf %48, %49 : vector<8x1xf32>
    %cst_24 = arith.constant 9.99999974E-6 : f32
    %51 = vector.broadcast %cst_24 : f32 to vector<8x1xf32>
    %52 = arith.addf %50, %51 : vector<8x1xf32>
    %53 = math.rsqrt %52 : vector<8x1xf32>
    %54 = vector.broadcast %53 : vector<8x1xf32> to vector<8x128xf32>
    %55 = arith.mulf %45, %54 : vector<8x128xf32>
    %56 = vector.broadcast %4 : vector<1x128xf32> to vector<8x128xf32>
    %57 = arith.mulf %55, %56 : vector<8x128xf32>
    %58 = vector.broadcast %5 : vector<1x128xf32> to vector<8x128xf32>
    %59 = arith.addf %57, %58 : vector<8x128xf32>
    %cst_25 = arith.constant 0.000000e+00 : f32
    %60 = vector.broadcast %cst_25 : f32 to vector<8x128xf32>
    %61 = arith.maximumf %59, %60 : vector<8x128xf32>
    %62 = arith.truncf %61 : vector<8x128xf32> to vector<8x128xbf16>
    %c0_26 = arith.constant 0 : index
    %c0_27 = arith.constant 0 : index
    %63 = vector.load %arg4[%c0_26, %c0_27] : memref<128x128xbf16, #tpu.memory_space<vmem>>, vector<128x128xbf16>
    %cst_28 = arith.constant dense<0.000000e+00> : vector<8x128xf32>
    %64 = tpu.matmul %62, %63, %cst_28 {dimension_numbers = #tpu.dot_dimension_numbers<[1], [0], [0], [1], [0, 0, 1, 1], [], []>} : vector<8x128xbf16>, vector<128x128xbf16>, vector<8x128xf32> -> vector<8x128xf32>
    %65 = vector.broadcast %6 : vector<1x128xf32> to vector<8x128xf32>
    %66 = arith.addf %64, %65 : vector<8x128xf32>
    %67 = tpu.iota {dimensions = array<i32: 1>} : vector<8x128xi32>
    %c8_i32 = arith.constant 8 : i32
    %68 = vector.broadcast %c8_i32 : i32 to vector<8x128xi32>
    %69 = arith.cmpi eq, %67, %68 : vector<8x128xi32>
    %cst_29 = arith.constant 0.000000e+00 : f32
    %70 = vector.broadcast %cst_29 : f32 to vector<8x128xf32>
    %71 = arith.select %69, %66, %70 : vector<8x128xi1>, vector<8x128xf32>
    %cst_30 = arith.constant dense<0.000000e+00> : vector<8xf32>
    %72 = vector.multi_reduction <add>, %71, %cst_30 [1] : vector<8x128xf32> to vector<8xf32>
    %73 = vector.shape_cast %72 : vector<8xf32> to vector<8x1xf32>
    %cst_31 = arith.constant dense<0.000000e+00> : vector<8xf32>
    %74 = vector.multi_reduction <add>, %66, %cst_31 [1] : vector<8x128xf32> to vector<8xf32>
    %75 = vector.shape_cast %74 : vector<8xf32> to vector<8x1xf32>
    %76 = arith.subf %75, %73 : vector<8x1xf32>
    %cst_32 = arith.constant 1.250000e-01 : f32
    %77 = vector.broadcast %cst_32 : f32 to vector<8x1xf32>
    %78 = arith.mulf %76, %77 : vector<8x1xf32>
    %79 = arith.subf %73, %78 : vector<8x1xf32>
    %80 = vector.broadcast %79 : vector<8x1xf32> to vector<8x128xf32>
    %81 = arith.addf %66, %80 : vector<8x128xf32>
    %82 = arith.truncf %81 : vector<8x128xf32> to vector<8x128xbf16>
    %c0_33 = arith.constant 0 : index
    %c0_34 = arith.constant 0 : index
    %83 = vector.load %arg6[%c0_33, %c0_34] : memref<8x128xbf16, #tpu.memory_space<vmem>>, vector<8x128xbf16>
    tpu.vector_store %arg6[%c0_33, %c0_34], %82 {strides = array<i32>} : memref<8x128xbf16, #tpu.memory_space<vmem>>, vector<8x128xbf16>,
    return
  }
  func.func @transform_0(%arg0: i32) -> (i32, i32) {
    %c0_i32 = arith.constant 0 : i32
    %c0_i32_0 = arith.constant 0 : i32
    return %arg0, %c0_i32 : i32, i32
  }
  func.func @transform_1(%arg0: i32) -> (i32, i32) {
    %c0_i32 = arith.constant 0 : i32
    %c0_i32_0 = arith.constant 0 : i32
    %c0_i32_1 = arith.constant 0 : i32
    return %c0_i32, %c0_i32_0 : i32, i32
  }
  func.func @transform_2(%arg0: i32) -> (i32, i32) {
    %c0_i32 = arith.constant 0 : i32
    %c0_i32_0 = arith.constant 0 : i32
    %c0_i32_1 = arith.constant 0 : i32
    return %c0_i32, %c0_i32_0 : i32, i32
  }
  func.func @transform_3(%arg0: i32) -> (i32, i32) {
    %c0_i32 = arith.constant 0 : i32
    %c0_i32_0 = arith.constant 0 : i32
    %c0_i32_1 = arith.constant 0 : i32
    return %c0_i32, %c0_i32_0 : i32, i32
  }
  func.func @transform_4(%arg0: i32) -> (i32, i32) {
    %c0_i32 = arith.constant 0 : i32
    %c0_i32_0 = arith.constant 0 : i32
    %c0_i32_1 = arith.constant 0 : i32
    return %c0_i32, %c0_i32_0 : i32, i32
  }
  func.func @transform_5(%arg0: i32) -> (i32, i32) {
    %c0_i32 = arith.constant 0 : i32
    %c0_i32_0 = arith.constant 0 : i32
    return %arg0, %c0_i32 : i32, i32
  }
}

</mosaic_0001>

<bundles_post_ra>
// kernel: dqn_forward.1
= control target key start
LH: loop header
LB: loop body
LE: loop exit
PB: predicated region body
PF: predicated region fallthrough
CT: control target
= control target key end

     0   :  { %10 = vsyncpa [#allocation3], 0  ;;  %s848_s0 = inlined_call_operand.hbm [shape: f32[8,16], index: 0, kind: input, shape index: {}]   ;;  %s849_s1 = inlined_call_operand.hbm [shape: bf16[16,128], index: 1, kind: input, shape index: {}]   ;;  %s850_s2 = inlined_call_operand.hbm [shape: bf16[128,128], index: 2, kind: input, shape index: {}]   ;;  %s851_s3 = inlined_call_operand.hbm [shape: bf16[128,128], index: 3, kind: input, shape index: {}]   ;;  %s852_s4 = inlined_call_operand.hbm [shape: f32[8,128], index: 4, kind: input, shape index: {}]   ;;  %s853_s5 = inlined_call_operand.hbm [shape: bf16[8,128], index: 5, kind: output, shape index: {}]  }
   0x1   :  { %11 = vsyncpa [#allocation6], 0 }
   0x2   :  { %12 = vsyncpa [#allocation9], 0 }
   0x3   :  { %13 = vsyncpa [#allocation4], 0  ;;  %s707_s18 = smov [#allocation5]   ;;  %s567_s22 = scalar_lea.hbm %s849_s1, 128 }
   0x4   :  { %s29_s19 = sshll.u32 %s707_s18, 4  ;;  %p568_p0 = scmp.ne.s32.totalorder %s849_s1, %s567_s22  ;;  %s30_s19 = int_to_ptr.vmem [resolvable:$true] %s29_s19 }
   0x5   :  { %p571_p1 = scmp.lt.u32.totalorder %s567_s22, %s849_s1 }
   0x7   :  { %p573_p2 = pnand %p571_p1, %p568_p0 }
   0x9   :  { %576 = shalt.err (!%p573_p2)
}
   0xa   :  { %s577_s27 = scalar_lea.vmem %s30_s19, 128  ;;  %p582_p4 = scmp.lt.s32.totalorder %s30_s19, %s30_s19 }
   0xb   :  { %p578_p3 = scmp.ne.s32.totalorder %s30_s19, %s577_s27  ;;  %p583_p5 = scmp.lt.s32.totalorder %s577_s27, %s577_s27 }
   0xd   :  { %p584_p6 = por %p583_p5, %p582_p4 }
   0xf   :  { %p585_p7 = pnand %p584_p6, %p578_p3 }
  0x11   :  { %588 = shalt.err (!%p585_p7)
}
  0x12   :  { %s708_s28 = smov 64   ;;  %s709_s29 = smov 4  }
  0x13   :  { %35 = dma.hbm_to_vmem [thread:$0]  %s849_s1, 128, %s30_s19, [#allocation6], %s708_s28, %s708_s28, %s709_s29  }
  0x14   :  { %s710_s7 = smov [#allocation8]   ;;  %s711_s9 = smov [#allocation2]  }
  0x15   :  { %s53_s8 = sshll.u32 %s710_s7, 4  ;;  %s20_s10 = sshll.u32 %s711_s9, 4  ;;  %s54_s8 = int_to_ptr.vmem [resolvable:$true] %s53_s8  ;;  %s21_s10 = int_to_ptr.vmem [resolvable:$true] %s20_s10 }
  0x16   :  { %s589_s13 = scalar_lea.hbm %s851_s3, 1024 }
  0x17   :  { %p590_p8 = scmp.ne.s32.totalorder %s851_s3, %s589_s13  ;;  %p593_p9 = scmp.lt.u32.totalorder %s589_s13, %s851_s3 }
  0x19   :  { %p595_p10 = pnand %p593_p9, %p590_p8 }
  0x1b   :  { %598 = shalt.err (!%p595_p10)
}
  0x1c   :  { %s599_s1 = scalar_lea.vmem %s54_s8, 1024  ;;  %p604_p12 = scmp.lt.s32.totalorder %s54_s8, %s54_s8 }
  0x1d   :  { %p600_p11 = scmp.ne.s32.totalorder %s54_s8, %s599_s1  ;;  %p605_p13 = scmp.lt.s32.totalorder %s599_s1, %s599_s1 }
  0x1f   :  { %p606_p0 = por %p605_p13, %p604_p12 }
  0x21   :  { %p607_p1 = pnand %p606_p0, %p600_p11 }
  0x23   :  { %610 = shalt.err (!%p607_p1)
}
  0x24   :  { %59 = dma.hbm_to_vmem [thread:$0]  %s851_s3, 1024, %s54_s8, [#allocation9], %s708_s28, %s708_s28, %s709_s29  }
  0x25   :  { %s611_s22 = scalar_lea.hbm %s848_s0, 128 }
  0x26   :  { %p612_p2 = scmp.ne.s32.totalorder %s848_s0, %s611_s22  ;;  %p615_p3 = scmp.lt.u32.totalorder %s611_s22, %s848_s0 }
  0x28   :  { %p617_p4 = pnand %p615_p3, %p612_p2 }
  0x2a   :  { %620 = shalt.err (!%p617_p4)
}
  0x2b   :  { %s621_s27 = scalar_lea.vmem %s21_s10, 128  ;;  %p626_p6 = scmp.lt.s32.totalorder %s21_s10, %s21_s10 }
  0x2c   :  { %p622_p5 = scmp.ne.s32.totalorder %s21_s10, %s621_s27  ;;  %p627_p7 = scmp.lt.s32.totalorder %s621_s27, %s621_s27 }
  0x2e   :  { %p628_p8 = por %p627_p7, %p626_p6 }
  0x30   :  { %p629_p9 = pnand %p628_p8, %p622_p5 }
  0x32   :  { %632 = shalt.err (!%p629_p9)
}
  0x33   :  { %23 = dma.hbm_to_vmem [thread:$0]  %s848_s0, 128, %s21_s10, [#allocation3]  }
  0x34   :  { %s712_s6 = smov [#allocation7]   ;;  %s713_s8 = smov [#allocation10]  }
  0x35   :  { %s41_s7 = sshll.u32 %s712_s6, 4  ;;  %s66_s9 = sshll.u32 %s713_s8, 4  ;;  %s42_s7 = int_to_ptr.vmem [resolvable:$true] %s41_s7  ;;  %s67_s9 = int_to_ptr.vmem [resolvable:$true] %s66_s9 }
  0x36   :  { %s633_s13 = scalar_lea.hbm %s850_s2, 1024 }
  0x37   :  { %p634_p10 = scmp.ne.s32.totalorder %s850_s2, %s633_s13  ;;  %p637_p11 = scmp.lt.u32.totalorder %s633_s13, %s850_s2 }
  0x39   :  { %p639_p12 = pnand %p637_p11, %p634_p10 }
  0x3b   :  { %642 = shalt.err (!%p639_p12)
}
  0x3c   :  { %s643_s0 = scalar_lea.vmem %s42_s7, 1024  ;;  %p648_p0 = scmp.lt.s32.totalorder %s42_s7, %s42_s7 }
  0x3d   :  { %p644_p13 = scmp.ne.s32.totalorder %s42_s7, %s643_s0  ;;  %p649_p1 = scmp.lt.s32.totalorder %s643_s0, %s643_s0 }
  0x3f   :  { %p650_p2 = por %p649_p1, %p648_p0 }
  0x41   :  { %p651_p3 = pnand %p650_p2, %p644_p13 }
  0x43   :  { %654 = shalt.err (!%p651_p3)
}
  0x44   :  { %47 = dma.hbm_to_vmem [thread:$0]  %s850_s2, 1024, %s42_s7, [#allocation6], %s708_s28, %s708_s28, %s709_s29  }
  0x45   :  { %s655_s20 = scalar_lea.hbm %s852_s4, 128 }
  0x46   :  { %p656_p4 = scmp.ne.s32.totalorder %s852_s4, %s655_s20  ;;  %p659_p5 = scmp.lt.u32.totalorder %s655_s20, %s852_s4 }
  0x48   :  { %p661_p6 = pnand %p659_p5, %p656_p4 }
  0x4a   :  { %664 = shalt.err (!%p661_p6)
}
  0x4b   :  { %s665_s25 = scalar_lea.vmem %s67_s9, 128  ;;  %p670_p8 = scmp.lt.s32.totalorder %s67_s9, %s67_s9 }
  0x4c   :  { %p666_p7 = scmp.ne.s32.totalorder %s67_s9, %s665_s25  ;;  %p671_p9 = scmp.lt.s32.totalorder %s665_s25, %s665_s25 }
  0x4e   :  { %p672_p10 = por %p671_p9, %p670_p8 }
  0x50   :  { %p673_p11 = pnand %p672_p10, %p666_p7 }
  0x52   :  { %676 = shalt.err (!%p673_p11)
}
  0x53   :  { %69 = dma.hbm_to_vmem [thread:$0]  %s852_s4, 128, %s67_s9, [#allocation9]  }
  0x54   :  { %699 = dma.done.wait [#allocation3], 128  }
  0x55   :  { %700 = vsyncadd [#allocation3], 4294967168 }
  0x56   :  { %701 = dma.done.wait [#allocation6], 1152  }
  0x57   :  { %702 = vsyncadd [#allocation6], 4294966144 }
  0x58   :  { %703 = dma.done.wait [#allocation9], 1152  }
  0x59   :  { %704 = vsyncadd [#allocation9], 4294966144  ;;  %v714_v0 = vmov 0.0   ;;  %vm715_vm0 = vmmov 0   ;;  %v546_v1 = vld [vmem:[#allocation5] sm:$0xff]   ;;  %v93_v2 = vld [vmem:[#allocation2] sm:$0xff]  ;;  %v414_v62 = vlaneseq }
  0x5a   :  { %490 = vmatprep.subr.bf16.mxu0 %v714_v0  ;;  %492 = vmatprep.mubr.msk.bf16.mxu0 %vm715_vm0, %v714_v0  ;;  %vm107_vm1 = vcmask 130048   ;;  %v94_v3 = vpack.c.bf16 %v93_v2, %v93_v2  ;;  %v445_v4 = vld [vmem:[#allocation10] ss:$0 sm:$0xff]  ;;  %v548_v11 = vld [vmem:[#allocation7 + $0x8] sm:$0xff]   ;;  %v549_v16 = vld [vmem:[#allocation7 + $0x10] sm:$0xff]   ;;  %s716_s4 = smov [#allocation11]  }
  0x5b   :  { %496 = vmatprep.subr.bf16.mxu1 %v714_v0  ;;  %512 = vmatprep.mubr.msk.bf16.mxu1 %vm715_vm0, %v714_v0  ;;  %v547_v10 = vld [vmem:[#allocation7] sm:$0xff]   ;;  %v550_v17 = vld [vmem:[#allocation7 + $0x18] sm:$0xff]   ;;  %v552_v19 = vld [vmem:[#allocation7 + $0x28] sm:$0xff]   ;;  %v415_v63 = vand.u32 127, %v414_v62  ;;  %s434_s29 = sshll.u32 %s716_s4, 4  ;;  %s435_s29 = int_to_ptr.vmem [resolvable:$true] %s434_s29 }
  0x5c   :  { %491 = vmatpush3.bf16.msra.mxu0 %v546_v1  ;;  %497 = vmatpush3.bf16.msra.mxu1 %v547_v10  ;;  %v551_v18 = vld [vmem:[#allocation7 + $0x20] sm:$0xff]   ;;  %v553_v20 = vld [vmem:[#allocation7 + $0x30] sm:$0xff]   ;;  %v554_v21 = vld [vmem:[#allocation7 + $0x38] sm:$0xff]   ;;  %s677_s26 = scalar_lea.vmem %s435_s29, 64  ;;  %p682_p13 = scmp.lt.s32.totalorder %s435_s29, %s435_s29 }
  0x5d   :  { %516 = vmatprep.subr.bf16.mxu0 %v714_v0  ;;  %498 = vmatprep.subr.bf16.mxu1 %v714_v0  ;;  %v448_v26 = vld [vmem:[#allocation10 + $0x1] ss:$0 sm:$0xff]  ;;  %v449_v28 = vld [vmem:[#allocation10 + $0x2] ss:$0 sm:$0xff]  ;;  %v450_v33 = vld [vmem:[#allocation10 + $0x3] ss:$0 sm:$0xff]  ;;  %p678_p12 = scmp.ne.s32.totalorder %s435_s29, %s677_s26  ;;  %p683_p0 = scmp.lt.s32.totalorder %s677_s26, %s677_s26 }
  0x5e   :  { %v555_v39 = vld [vmem:[#allocation8] sm:$0xff]   ;;  %v556_v40 = vld [vmem:[#allocation8 + $0x8] sm:$0xff]   ;;  %v557_v45 = vld [vmem:[#allocation8 + $0x10] sm:$0xff]   ;;  %vm416_vm2 = vcmp.eq.s32.totalorder %v415_v63, 8 }
  0x5f   :  { %493 = vmatmul.mubr.msk.bf16.vlgmr.msra.gmra.mrb[0].mxu0 %vm107_vm1, %v94_v3  ;;  %v558_v46 = vld [vmem:[#allocation8 + $0x18] sm:$0xff]   ;;  %v559_v47 = vld [vmem:[#allocation8 + $0x20] sm:$0xff]   ;;  %v560_v48 = vld [vmem:[#allocation8 + $0x28] sm:$0xff]   ;;  %p684_p1 = por %p683_p0, %p682_p13 }
  0x60   :  { %532 = vmatprep.mubr.msk.bf16.mxu0 %vm715_vm0, %v714_v0  ;;  %499 = vmatpush3.bf16.msra.mxu1 %v548_v11  ;;  %v561_v49 = vld [vmem:[#allocation8 + $0x30] sm:$0xff]   ;;  %v562_v50 = vld [vmem:[#allocation8 + $0x38] sm:$0xff]   ;;  %v459_v55 = vld [vmem:[#allocation10 + $0x4] ss:$0 sm:$0xff] }
  0x61   :  { %500 = vmatprep.subr.bf16.mxu1 %v714_v0  ;;  %517 = vmatpush3.bf16.msra.mxu0 %v555_v39  ;;  %v460_v57 = vld [vmem:[#allocation10 + $0x5] ss:$0 sm:$0xff]  ;;  %v461_v1 = vld [vmem:[#allocation10 + $0x6] ss:$0 sm:$0xff]  ;;  %p685_p2 = pnand %p684_p1, %p678_p12 }
  0x62   :  { %518 = vmatprep.subr.bf16.mxu0 %v714_v0 }
  0x64   :  { %501 = vmatpush3.bf16.msra.mxu1 %v549_v16 }
  0x65   :  { %502 = vmatprep.subr.bf16.mxu1 %v714_v0  ;;  %519 = vmatpush3.bf16.msra.mxu0 %v556_v40 }
  0x66   :  { %520 = vmatprep.subr.bf16.mxu0 %v714_v0 }
  0x68   :  { %503 = vmatpush3.bf16.msra.mxu1 %v550_v17 }
  0x69   :  { %504 = vmatprep.subr.bf16.mxu1 %v714_v0  ;;  %521 = vmatpush3.bf16.msra.mxu0 %v557_v45 }
  0x6a   :  { %522 = vmatprep.subr.bf16.mxu0 %v714_v0 }
  0x6c   :  { %505 = vmatpush3.bf16.msra.mxu1 %v551_v18 }
  0x6d   :  { %506 = vmatprep.subr.bf16.mxu1 %v714_v0  ;;  %523 = vmatpush3.bf16.msra.mxu0 %v558_v46 }
  0x6e   :  { %524 = vmatprep.subr.bf16.mxu0 %v714_v0 }
  0x70   :  { %507 = vmatpush3.bf16.msra.mxu1 %v552_v19 }
  0x71   :  { %508 = vmatprep.subr.bf16.mxu1 %v714_v0  ;;  %525 = vmatpush3.bf16.msra.mxu0 %v559_v47 }
  0x72   :  { %526 = vmatprep.subr.bf16.mxu0 %v714_v0 }
  0x74   :  { %509 = vmatpush3.bf16.msra.mxu1 %v553_v20 }
  0x75   :  { %510 = vmatprep.subr.bf16.mxu1 %v714_v0  ;;  %527 = vmatpush3.bf16.msra.mxu0 %v560_v48 }
  0x76   :  { %528 = vmatprep.subr.bf16.mxu0 %v714_v0 }
  0x78   :  { %511 = vmatpush3.bf16.msra.mxu1 %v554_v21 }
  0x79   :  { %529 = vmatpush3.bf16.msra.mxu0 %v561_v49 }
  0x7a   :  { %530 = vmatprep.subr.bf16.mxu0 %v714_v0 }
  0x7d   :  { %531 = vmatpush3.bf16.msra.mxu0 %v562_v50 }
 0x132   :  { %v145_v5 = vpop.f32.mrb[0].mxu0 }
 0x133   :  { %v146_v6 = vadd.f32 %v445_v4, %v145_v5  ;;  %v494_v7 = vpop.f32.mrb[1].mxu0 }
 0x134   :  { %v148_v8 = vpop.f32.mrb[2].mxu0 }
 0x135   :  { %v495_v9 = vpop.f32.mrb[3].mxu0  ;;  %151 = vadd.xlane.f32.xlu0 %v146_v6 }
 0x1c2   :  { %v152_v12 = vpop.xlane.xlu0 %151 }
 0x1c3   :  { %v154_v13 = vmul.f32 0.0078125, %v152_v12 }
 0x1c5   :  { %v155_v14 = vsub.f32 %v146_v6, %v154_v13 }
 0x1c7   :  { %v156_v15 = vmul.f32 %v155_v14, %v155_v14 }
 0x1c9   :  { %157 = vadd.xlane.f32.xlu0 %v156_v15 }
 0x256   :  { %v158_v22 = vpop.xlane.xlu0 %157 }
 0x257   :  { %v159_v23 = vmul.f32 0.0078125, %v158_v22 }
 0x259   :  { %v160_v24 = vadd.f32 1e-05, %v159_v23 }
 0x25b   :  { %563 = vrsqrt.f32 %v160_v24 }
 0x265   :  { %v564_v25 = vpop.eup %563 }
 0x266   :  { %v162_v27 = vmul.f32 %v564_v25, %v155_v14 }
 0x268   :  { %v167_v29 = vmul.f32 %v448_v26, %v162_v27 }
 0x26a   :  { %v172_v30 = vadd.f32 %v449_v28, %v167_v29 }
 0x26c   :  { %v173_v31 = vmax.f32 %v172_v30, 0.0 }
 0x26e   :  { %v174_v32 = vpack.c.bf16 %v173_v31, %v173_v31 }
 0x270   :  { %513 = vmatmul.mubr.bf16.vlgmr.msra.gmra.mrb[0].mxu1 %v174_v32 }
 0x343   :  { %v277_v34 = vpop.f32.mrb[0].mxu1 }
 0x344   :  { %v278_v35 = vadd.f32 %v450_v33, %v277_v34  ;;  %v514_v36 = vpop.f32.mrb[1].mxu1 }
 0x345   :  { %v280_v37 = vpop.f32.mrb[2].mxu1 }
 0x346   :  { %283 = vadd.xlane.f32.xlu1 %v278_v35  ;;  %v515_v38 = vpop.f32.mrb[3].mxu1 }
 0x3d3   :  { %v284_v41 = vpop.xlane.xlu1 %283 }
 0x3d4   :  { %v285_v42 = vmul.f32 0.0078125, %v284_v41 }
 0x3d6   :  { %v286_v43 = vsub.f32 %v278_v35, %v285_v42 }
 0x3d8   :  { %v287_v44 = vmul.f32 %v286_v43, %v286_v43 }
 0x3da   :  { %288 = vadd.xlane.f32.xlu1 %v287_v44 }
 0x467   :  { %v289_v51 = vpop.xlane.xlu1 %288 }
 0x468   :  { %v290_v52 = vmul.f32 0.0078125, %v289_v51 }
 0x46a   :  { %v291_v53 = vadd.f32 1e-05, %v290_v52 }
 0x46c   :  { %565 = vrsqrt.f32 %v291_v53 }
 0x476   :  { %v566_v54 = vpop.eup %565 }
 0x477   :  { %v293_v56 = vmul.f32 %v566_v54, %v286_v43 }
 0x479   :  { %v298_v58 = vmul.f32 %v459_v55, %v293_v56 }
 0x47b   :  { %v303_v59 = vadd.f32 %v460_v57, %v298_v58 }
 0x47d   :  { %v304_v60 = vmax.f32 %v303_v59, 0.0 }
 0x47f   :  { %v305_v61 = vpack.c.bf16 %v304_v60, %v304_v60 }
 0x481   :  { %533 = vmatmul.mubr.bf16.vlgmr.msra.gmra.mrb[4].mxu0 %v305_v61 }
 0x554   :  { %v408_v2 = vpop.f32.mrb[4].mxu0 }
 0x555   :  { %v409_v0 = vadd.f32 %v461_v1, %v408_v2  ;;  %v534_v3 = vpop.f32.mrb[5].mxu0 }
 0x556   :  { %v411_v4 = vpop.f32.mrb[6].mxu0 }
 0x557   :  { %420 = vadd.xlane.f32.xlu1 %v409_v0  ;;  %v535_v5 = vpop.f32.mrb[7].mxu0  ;;  %v417_v6 = vsel %vm416_vm2, %v409_v0, 0.0 }
 0x558   :  { %418 = vadd.xlane.f32.xlu0 %v417_v6 }
 0x5e4   :  { %v421_v7 = vpop.xlane.xlu1 %420 }
 0x5e5   :  { %v419_v8 = vpop.xlane.xlu0 %418 }
 0x5e6   :  { %v422_v9 = vsub.f32 %v421_v7, %v419_v8 }
 0x5e8   :  { %v423_v10 = vmul.f32 0.125, %v422_v9 }
 0x5ea   :  { %v424_v11 = vsub.f32 %v419_v8, %v423_v10 }
 0x5ec   :  { %v425_v12 = vadd.f32 %v424_v11, %v409_v0 }
 0x5ee   :  { %v426_v13 = vpack.c.bf16 %v425_v12, %v425_v12 }
 0x5f0   :  { %427 = vst [vmem:[#allocation11] sm:$0xf] %v426_v13 }
 0x5f1   :  { %688 = shalt.err (!%p685_p2)
}
 0x5f2   :  { %s689_s30 = scalar_lea.hbm %s853_s5, 64 }
 0x5f3   :  { %p690_p3 = scmp.ne.s32.totalorder %s853_s5, %s689_s30  ;;  %p693_p4 = scmp.lt.u32.totalorder %s689_s30, %s853_s5 }
 0x5f5   :  { %p695_p5 = pnand %p693_p4, %p690_p3 }
 0x5f7   :  { %698 = shalt.err (!%p695_p5)
}
 0x5f8   :  { %437 = dma.vmem_to_hbm [thread:$0]  %s435_s29, 64, %s853_s5, [#allocation4]  }
 0x5f9   :  { %705 = dma.done.wait [#allocation4], 64  }
 0x5fa   :  { %706 = vsyncadd [#allocation4], 4294967232 }
 0x5fb   :  { %441 = vsyncpa [#allocation3], 1 }
 0x5fc   :  { %442 = vsyncpa [#allocation6], 1 }
 0x5fd   :  { %443 = vsyncpa [#allocation9], 1 }
 0x5fe   :  { %444 = vsyncpa [#allocation4], 1 }

</bundles_post_ra>
